<compile_context>
chip_gen: v7x
topology: tpu7x:2x2x1
jax: 0.10.0
libtpu: 0.0.40
codegen_flags: <defaults>
</compile_context>

<pallas_src>
import functools

import jax
import jax.numpy as jnp
from jax.experimental import pallas as pl
from jax.experimental.pallas import tpu as pltpu

LANE = 128          # padded feature width (lane-dense); requires hidden, output <= 128
IN0 = 28 * 28       # flattened image = first-layer contraction depth after conv folding


def _vmem():
    return pl.BlockSpec(memory_space=pltpu.MemorySpace.VMEM)


# --------------------------- fused forward kernel --------------------------- #
def make_fused_kernel(num_layers, seq_len):
    """(folded conv + layer-0 proj) -> L-layer tanh RNN (instance 31 only) -> Linear."""
    T = seq_len

    def kernel(x_ref, slab_ref, out_ref):
        # x_ref:    (T, 784)    flattened images (T == image batch == RNN seq length)
        # slab_ref: (rows, 128) packed constants, 8x128-aligned blocks (see prepare_params)
        # out_ref:  (T, 128)    lane-dense logits (cols >= output_size are exactly 0)
        seq = x_ref[...]
        off = 0
        for layer in range(num_layers):
            in_rows = IN0 if layer == 0 else LANE
            w_ih = slab_ref[off:off + in_rows, :]   # layer 0: conv already folded in
            off += in_rows
            w_hh = slab_ref[off:off + LANE, :]      # (128,128), zero outside [:H,:H]
            off += LANE
            bias = slab_ref[off:off + 1, :]         # (1,128), b_ih+b_hh (+conv term, l=0)
            off += 8                                # bias blocks are padded to 8 rows
            # Whole-sequence input projection: one MXU matmul per layer.
            gi = jnp.dot(seq, w_ih, preferred_element_type=jnp.float32) + bias
            # Serial tanh recurrence; hidden states stay in vregs (no VMEM bounce).
            # TODO(synk): if T grows, hold w_hh in MXU weight regs
            # (pltpu.matmul_push_rhs/acc_lhs/pop) and wavefront the (layer, t) nest.
            h = jnp.zeros((1, LANE), jnp.float32)
            hs = []
            for t in range(T):
                h = jnp.tanh(
                    gi[t:t + 1, :]
                    + jnp.dot(h, w_hh, preferred_element_type=jnp.float32))
                hs.append(h)
            seq = hs[0] if T == 1 else jnp.concatenate(hs, axis=0)   # (T, 128)
        fc_w = slab_ref[off:off + LANE, :]
        off += LANE
        fc_b = slab_ref[off:off + 1, :]
        out_ref[...] = (jnp.dot(seq, fc_w, preferred_element_type=jnp.float32)
                        + fc_b)

    return kernel


def simple_rnn_forward(x, slab, *, num_layers, output_size):
    """x: (B, 1, 28, 28) float32 NCHW (as in PyTorch). slab: prepare_params() output."""
    B = x.shape[0]
    x_flat = x.reshape(B, IN0)   # free relayout of the contiguous C=1 NCHW input
    out_pad = pl.pallas_call(
        make_fused_kernel(num_layers, B),
        out_shape=jax.ShapeDtypeStruct((B, LANE), jnp.float32),
        in_specs=[_vmem(), _vmem()],
        out_specs=_vmem(),
    )(x_flat, slab)
    return out_pad[:, :output_size]


# -------------------------------- parameters -------------------------------- #
def init_params(key, hidden_size, output_size, num_layers):
    """PyTorch-shaped parameters for SimpleRNN."""
    ks = iter(jax.random.split(key, 4 + 4 * num_layers))

    def u(k, shape, scale):
        return jax.random.uniform(k, shape, jnp.float32, -scale, scale)

    H = hidden_size
    s = 1.0 / (H ** 0.5)
    params = {
        "conv_w": u(next(ks), (32, 1, 4, 4), 0.25),
        "conv_b": u(next(ks), (32,), 0.25),
        "fc_w": u(next(ks), (output_size, H), s),
        "fc_b": u(next(ks), (output_size,), s),
        "rnn": [],
    }
    for l in range(num_layers):
        in_l = 49 if l == 0 else H
        params["rnn"].append({
            "w_ih": u(next(ks), (H, in_l), s),
            "w_hh": u(next(ks), (H, H), s),
            "b_ih": u(next(ks), (H,), s),
            "b_hh": u(next(ks), (H,), s),
        })
    return params


def prepare_params(params):
    """One-time packing of PyTorch-shaped params into a single (rows, 128) f32 slab."""
    H = params["rnn"][0]["w_hh"].shape[0]
    O = params["fc_w"].shape[0]
    assert H <= LANE and O <= LANE, "hidden/output size must fit in one 128-lane tile"

    def pad_block(a, rows):
        a = jnp.asarray(a, jnp.float32)
        return jnp.zeros((rows, LANE), jnp.float32).at[:a.shape[0], :a.shape[1]].set(a)

    # Fold conv out-channel 31 and the 4x4-patch permutation into layer 0's projection.
    cw = params["conv_w"][31, 0]                            # (4, 4)  indexed [r, c]
    cb = params["conv_b"][31]
    w_ih0_t = params["rnn"][0]["w_ih"].T                    # (49, H) indexed [7i+j, h]
    w0 = (cw[None, :, None, :, None] *
          w_ih0_t.reshape(7, 7, H)[:, None, :, None, :]).reshape(IN0, H)
    b0 = (params["rnn"][0]["b_ih"] + params["rnn"][0]["b_hh"]
          + cb * w_ih0_t.sum(axis=0))

    blocks = [pad_block(w0, IN0),                           # layer 0 input proj (conv folded)
              pad_block(params["rnn"][0]["w_hh"].T, LANE),
              pad_block(b0.reshape(1, H), 8)]
    for layer in params["rnn"][1:]:
        blocks += [pad_block(layer["w_ih"].T, LANE),
                   pad_block(layer["w_hh"].T, LANE),
                   pad_block((layer["b_ih"] + layer["b_hh"]).reshape(1, H), 8)]
    blocks += [pad_block(params["fc_w"].T, LANE),
               pad_block(params["fc_b"].reshape(1, O), 8)]
    return jnp.concatenate(blocks, axis=0)                  # (rows, 128), rows % 8 == 0


# ----------------------------- pure-JAX reference --------------------------- #
def reference_forward(x, params):
    """Literal translation of the PyTorch forward (full 32-instance RNN)."""
    with jax.default_matmul_precision("highest"):
        B = x.shape[0]
        patches = (x.reshape(B, 7, 4, 7, 4)
                   .transpose(0, 1, 3, 2, 4)
                   .reshape(B, 49, 16))
        w = params["conv_w"].reshape(32, 16)
        conv = jnp.einsum("bpk,ok->bop", patches, w) + params["conv_b"][None, :, None]
        h_in = jnp.transpose(conv, (1, 0, 2))          # (32, B, 49) as fed to nn.RNN
        for layer in params["rnn"]:
            b = layer["b_ih"] + layer["b_hh"]
            h = jnp.zeros((32, layer["w_hh"].shape[0]), jnp.float32)
            outs = []
            for t in range(h_in.shape[1]):
                h = jnp.tanh(h_in[:, t, :] @ layer["w_ih"].T + h @ layer["w_hh"].T + b)
                outs.append(h)
            h_in = jnp.stack(outs, axis=1)             # (32, B, H)
        last = h_in[-1]                                # out[-1, :, :] -> (B, H)
        return last @ params["fc_w"].T + params["fc_b"]


if __name__ == "__main__":
    hidden_size, output_size, num_layers = 32, 10, 2
    B = 2   # image batch == RNN sequence length (PyTorch layout quirk)

    key = jax.random.PRNGKey(0)
    k_x, k_p = jax.random.split(key)
    # RNN(49, ...) implies a 28x28 single-channel input (7x7 conv output = 49).
    x = jax.random.normal(k_x, (B, 1, 28, 28), jnp.float32)
    params = init_params(k_p, hidden_size, output_size, num_layers)
    slab = prepare_params(params)

    fwd = jax.jit(functools.partial(simple_rnn_forward,
                                    num_layers=num_layers,
                                    output_size=output_size))
    out = fwd(x, slab)
    jax.block_until_ready(out)
    assert out.shape == (B, output_size), out.shape

    ref = reference_forward(x, params)
    max_err = float(jnp.max(jnp.abs(out - ref)))
    # Tolerance note: the in-kernel f32 dots run at Mosaic's default MXU precision,
    # which may use bf16 passes on some generations (worst case ~few e-3 here), so we
    # cannot safely assert 1e-4 across v5e/v6e/v7x.  1e-2 still catches any layout,
    # packing or conv-fold indexing bug, which would produce O(0.1-1) errors.
    assert max_err < 1e-2, f"mismatch vs reference: max abs err {max_err}"
    print("KERNEL_OK")
</pallas_src>

<mosaic_0001>
module attributes {stable_mosaic.version = 11 : i64} {
  func.func @kernel(%arg0: memref<2x784xf32, #tpu.memory_space<vmem>>, %arg1: memref<1320x128xf32, #tpu.memory_space<vmem>>, %arg2: memref<2x128xf32, #tpu.memory_space<vmem>>) attributes {dimension_semantics = [], scalar_prefetch = 0 : i64, scratch_operands = 0 : i64, tpu.core_type = #tpu.core_type<tc>} {
    %c0 = arith.constant 0 : index
    %c0_0 = arith.constant 0 : index
    %0 = vector.load %arg0[%c0, %c0_0] : memref<2x784xf32, #tpu.memory_space<vmem>>, vector<2x784xf32>
    %c0_1 = arith.constant 0 : index
    %c0_2 = arith.constant 0 : index
    %1 = vector.load %arg1[%c0_1, %c0_2] : memref<1320x128xf32, #tpu.memory_space<vmem>>, vector<784x128xf32>
    %c784 = arith.constant 784 : index
    %c0_3 = arith.constant 0 : index
    %2 = vector.load %arg1[%c784, %c0_3] : memref<1320x128xf32, #tpu.memory_space<vmem>>, vector<128x128xf32>
    %c912 = arith.constant 912 : index
    %c0_4 = arith.constant 0 : index
    %3 = vector.load %arg1[%c912, %c0_4] : memref<1320x128xf32, #tpu.memory_space<vmem>>, vector<1x128xf32>
    %cst = arith.constant dense<0.000000e+00> : vector<2x128xf32>
    %4 = tpu.matmul %0, %1, %cst {dimension_numbers = #tpu.dot_dimension_numbers<[1], [0], [0], [1], [0, 0, 1, 1], [], []>} : vector<2x784xf32>, vector<784x128xf32>, vector<2x128xf32> -> vector<2x128xf32>
    %5 = vector.broadcast %3 : vector<1x128xf32> to vector<2x128xf32>
    %6 = arith.addf %4, %5 : vector<2x128xf32>
    %cst_5 = arith.constant 0.000000e+00 : f32
    %7 = vector.broadcast %cst_5 : f32 to vector<1x128xf32>
    %8 = vector.extract_strided_slice %6 {offsets = [0, 0], sizes = [1, 128], strides = [1, 1]} : vector<2x128xf32> to vector<1x128xf32>
    %cst_6 = arith.constant dense<0.000000e+00> : vector<1x128xf32>
    %9 = tpu.matmul %7, %2, %cst_6 {dimension_numbers = #tpu.dot_dimension_numbers<[1], [0], [0], [1], [0, 0, 1, 1], [], []>} : vector<1x128xf32>, vector<128x128xf32>, vector<1x128xf32> -> vector<1x128xf32>
    %10 = arith.addf %8, %9 : vector<1x128xf32>
    %11 = math.tanh %10 : vector<1x128xf32>
    %12 = vector.extract_strided_slice %6 {offsets = [1, 0], sizes = [1, 128], strides = [1, 1]} : vector<2x128xf32> to vector<1x128xf32>
    %cst_7 = arith.constant dense<0.000000e+00> : vector<1x128xf32>
    %13 = tpu.matmul %11, %2, %cst_7 {dimension_numbers = #tpu.dot_dimension_numbers<[1], [0], [0], [1], [0, 0, 1, 1], [], []>} : vector<1x128xf32>, vector<128x128xf32>, vector<1x128xf32> -> vector<1x128xf32>
    %14 = arith.addf %12, %13 : vector<1x128xf32>
    %15 = math.tanh %14 : vector<1x128xf32>
    %16 = tpu.concatenate %11, %15 in 0 : vector<1x128xf32>, vector<1x128xf32> -> vector<2x128xf32>
    %c920 = arith.constant 920 : index
    %c0_8 = arith.constant 0 : index
    %17 = vector.load %arg1[%c920, %c0_8] : memref<1320x128xf32, #tpu.memory_space<vmem>>, vector<128x128xf32>
    %c1048 = arith.constant 1048 : index
    %c0_9 = arith.constant 0 : index
    %18 = vector.load %arg1[%c1048, %c0_9] : memref<1320x128xf32, #tpu.memory_space<vmem>>, vector<128x128xf32>
    %c1176 = arith.constant 1176 : index
    %c0_10 = arith.constant 0 : index
    %19 = vector.load %arg1[%c1176, %c0_10] : memref<1320x128xf32, #tpu.memory_space<vmem>>, vector<1x128xf32>
    %cst_11 = arith.constant dense<0.000000e+00> : vector<2x128xf32>
    %20 = tpu.matmul %16, %17, %cst_11 {dimension_numbers = #tpu.dot_dimension_numbers<[1], [0], [0], [1], [0, 0, 1, 1], [], []>} : vector<2x128xf32>, vector<128x128xf32>, vector<2x128xf32> -> vector<2x128xf32>
    %21 = vector.broadcast %19 : vector<1x128xf32> to vector<2x128xf32>
    %22 = arith.addf %20, %21 : vector<2x128xf32>
    %cst_12 = arith.constant 0.000000e+00 : f32
    %23 = vector.broadcast %cst_12 : f32 to vector<1x128xf32>
    %24 = vector.extract_strided_slice %22 {offsets = [0, 0], sizes = [1, 128], strides = [1, 1]} : vector<2x128xf32> to vector<1x128xf32>
    %cst_13 = arith.constant dense<0.000000e+00> : vector<1x128xf32>
    %25 = tpu.matmul %23, %18, %cst_13 {dimension_numbers = #tpu.dot_dimension_numbers<[1], [0], [0], [1], [0, 0, 1, 1], [], []>} : vector<1x128xf32>, vector<128x128xf32>, vector<1x128xf32> -> vector<1x128xf32>
    %26 = arith.addf %24, %25 : vector<1x128xf32>
    %27 = math.tanh %26 : vector<1x128xf32>
    %28 = vector.extract_strided_slice %22 {offsets = [1, 0], sizes = [1, 128], strides = [1, 1]} : vector<2x128xf32> to vector<1x128xf32>
    %cst_14 = arith.constant dense<0.000000e+00> : vector<1x128xf32>
    %29 = tpu.matmul %27, %18, %cst_14 {dimension_numbers = #tpu.dot_dimension_numbers<[1], [0], [0], [1], [0, 0, 1, 1], [], []>} : vector<1x128xf32>, vector<128x128xf32>, vector<1x128xf32> -> vector<1x128xf32>
    %30 = arith.addf %28, %29 : vector<1x128xf32>
    %31 = math.tanh %30 : vector<1x128xf32>
    %32 = tpu.concatenate %27, %31 in 0 : vector<1x128xf32>, vector<1x128xf32> -> vector<2x128xf32>
    %c1184 = arith.constant 1184 : index
    %c0_15 = arith.constant 0 : index
    %33 = vector.load %arg1[%c1184, %c0_15] : memref<1320x128xf32, #tpu.memory_space<vmem>>, vector<128x128xf32>
    %c1312 = arith.constant 1312 : index
    %c0_16 = arith.constant 0 : index
    %34 = vector.load %arg1[%c1312, %c0_16] : memref<1320x128xf32, #tpu.memory_space<vmem>>, vector<1x128xf32>
    %cst_17 = arith.constant dense<0.000000e+00> : vector<2x128xf32>
    %35 = tpu.matmul %32, %33, %cst_17 {dimension_numbers = #tpu.dot_dimension_numbers<[1], [0], [0], [1], [0, 0, 1, 1], [], []>} : vector<2x128xf32>, vector<128x128xf32>, vector<2x128xf32> -> vector<2x128xf32>
    %36 = vector.broadcast %34 : vector<1x128xf32> to vector<2x128xf32>
    %37 = arith.addf %35, %36 : vector<2x128xf32>
    %c0_18 = arith.constant 0 : index
    %c0_19 = arith.constant 0 : index
    %38 = vector.load %arg2[%c0_18, %c0_19] : memref<2x128xf32, #tpu.memory_space<vmem>>, vector<2x128xf32>
    tpu.vector_store %arg2[%c0_18, %c0_19], %37 {strides = array<i32>} : memref<2x128xf32, #tpu.memory_space<vmem>>, vector<2x128xf32>,
    return
  }
}

</mosaic_0001>

<bundles_post_ra>
// kernel: simple_rnn_forward.1
= control target key start
LH: loop header
LB: loop body
LE: loop exit
PB: predicated region body
PF: predicated region fallthrough
CT: control target
= control target key end

     0   :  { %7 = vsyncpa [#allocation3], 0  ;;  %s1885_s0 = inlined_call_operand.vmem [shape: f32[2,784], index: 0, kind: input, shape index: {}]   ;;  %s1886_s1 = inlined_call_operand.hbm [shape: f32[1320,128], index: 1, kind: input, shape index: {}]   ;;  %s1887_s2 = inlined_call_operand.hbm [shape: f32[2,128], index: 2, kind: output, shape index: {}]  }
   0x1   :  { %8 = vsyncpa [#allocation4], 0  ;;  %s1722_s9 = smov [#allocation2]   ;;  %s1674_s13 = scalar_lea.hbm %s1886_s1, 21120 }
   0x2   :  { %s16_s10 = sshll.u32 %s1722_s9, 4  ;;  %p1675_p0 = scmp.ne.s32.totalorder %s1886_s1, %s1674_s13  ;;  %s17_s10 = int_to_ptr.vmem [resolvable:$true] %s16_s10 }
   0x3   :  { %p1678_p1 = scmp.lt.u32.totalorder %s1674_s13, %s1886_s1 }
   0x5   :  { %p1680_p2 = pnand %p1678_p1, %p1675_p0 }
   0x7   :  { %1683 = shalt.err (!%p1680_p2)
}
   0x8   :  { %s1684_s18 = scalar_lea.vmem %s17_s10, 21120  ;;  %p1689_p4 = scmp.lt.s32.totalorder %s17_s10, %s17_s10 }
   0x9   :  { %p1685_p3 = scmp.ne.s32.totalorder %s17_s10, %s1684_s18  ;;  %p1690_p5 = scmp.lt.s32.totalorder %s1684_s18, %s1684_s18 }
   0xb   :  { %p1691_p6 = por %p1690_p5, %p1689_p4 }
   0xd   :  { %p1692_p7 = pnand %p1691_p6, %p1685_p3 }
   0xf   :  { %1695 = shalt.err (!%p1692_p7)
}
  0x10   :  { %s1723_s19 = smov 128   ;;  %s1724_s20 = smov 8  }
  0x11   :  { %22 = dma.hbm_to_vmem [thread:$0]  %s1886_s1, 21120, %s17_s10, [#allocation3], %s1723_s19, %s1723_s19, %s1724_s20  }
  0x12   :  { %1718 = dma.done.wait [#allocation3], 21120  }
  0x13   :  { %1719 = vsyncadd [#allocation3], 4294946176  ;;  %v44_v0 = vld [vmem:[#allocation2 + $0x80] sm:$0xff]  ;;  %v45_v1 = vld [vmem:[#allocation2 + $0x88] sm:$0xff]  ;;  %v1725_v43 = vmov 1983009808   ;;  %v153_v45 = vlaneseq }
  0x14   :  { %v28_v2 = vld [vmem:[#allocation2] sm:$0xff]  ;;  %v1413_v3 = vpack.c.bf16 %v45_v1, %v44_v0  ;;  %v29_v4 = vld [vmem:[#allocation2 + $0x8] sm:$0xff]  ;;  %v46_v11 = vld [vmem:[#allocation2 + $0x90] sm:$0xff]  ;;  %v151_v44 = vunpack.c.l.s4 %v1725_v43  ;;  %vm188_vm0 = vcmask 130048   ;;  %vm1727_vm1 = vmmov 0  }
  0x15   :  { %v76_v5 = vld [vmem:[#allocation2 + $0x180] sm:$0xff]  ;;  %v77_v6 = vld [vmem:[#allocation2 + $0x188] sm:$0xff]  ;;  %v1415_v7 = vpack.c.bf16 %v29_v4, %v28_v2  ;;  %v47_v13 = vld [vmem:[#allocation2 + $0x98] sm:$0xff]  ;;  %v154_v60 = vshrl.u32 %v153_v45, 7  ;;  %vm618_vm2 = vcmask 1040384  }
  0x16   :  { %v1445_v8 = vpack.c.bf16 %v77_v6, %v76_v5  ;;  %v60_v9 = vld [vmem:[#allocation2 + $0x100] sm:$0xff]  ;;  %v61_v10 = vld [vmem:[#allocation2 + $0x108] sm:$0xff]  ;;  %1414 = vmatprep.subr.bf16.mxu0 %v1413_v3  ;;  %v30_v14 = vld [vmem:[#allocation2 + $0x10] sm:$0xff]  ;;  %v1417_v16 = vpack.c.bf16 %v47_v13, %v46_v11  ;;  %v152_v59 = vunpack.c.0.s8 %v151_v44 }
  0x17   :  { %v1447_v12 = vpack.c.bf16 %v61_v10, %v60_v9  ;;  %v31_v15 = vld [vmem:[#allocation2 + $0x18] sm:$0xff]  ;;  %1416 = vmatpush3.bf16.msra.mxu0 %v1415_v7  ;;  %v78_v18 = vld [vmem:[#allocation2 + $0x190] sm:$0xff]  ;;  %v48_v23 = vld [vmem:[#allocation2 + $0xa0] sm:$0xff] }
  0x18   :  { %1446 = vmatprep.subr.bf16.mxu1 %v1445_v8  ;;  %v1419_v17 = vpack.c.bf16 %v31_v15, %v30_v14  ;;  %v79_v19 = vld [vmem:[#allocation2 + $0x198] sm:$0xff]  ;;  %v62_v20 = vld [vmem:[#allocation2 + $0x110] sm:$0xff]  ;;  %v49_v24 = vld [vmem:[#allocation2 + $0xa8] sm:$0xff]  ;;  %1418 = vmatprep.subr.bf16.mxu0 %v1417_v16  ;;  %v1757_v10 = vsub.s32 %v152_v59, %v154_v60 }
  0x19   :  { %1448 = vmatpush3.bf16.msra.mxu1 %v1447_v12  ;;  %v1449_v21 = vpack.c.bf16 %v79_v19, %v78_v18  ;;  %v63_v22 = vld [vmem:[#allocation2 + $0x118] sm:$0xff]  ;;  %v1421_v26 = vpack.c.bf16 %v49_v24, %v48_v23  ;;  %v32_v27 = vld [vmem:[#allocation2 + $0x20] sm:$0xff]  ;;  %v33_v28 = vld [vmem:[#allocation2 + $0x28] sm:$0xff] }
  0x1a   :  { %v1451_v25 = vpack.c.bf16 %v63_v22, %v62_v20  ;;  %v80_v29 = vld [vmem:[#allocation2 + $0x1a0] sm:$0xff]  ;;  %v81_v30 = vld [vmem:[#allocation2 + $0x1a8] sm:$0xff]  ;;  %v1423_v33 = vpack.c.bf16 %v33_v28, %v32_v27  ;;  %v50_v35 = vld [vmem:[#allocation2 + $0xb0] sm:$0xff] }
  0x1b   :  { %1450 = vmatprep.subr.bf16.mxu1 %v1449_v21  ;;  %v64_v31 = vld [vmem:[#allocation2 + $0x120] sm:$0xff]  ;;  %v65_v32 = vld [vmem:[#allocation2 + $0x128] sm:$0xff]  ;;  %1420 = vmatpush3.bf16.msra.mxu0 %v1419_v17  ;;  %v1453_v34 = vpack.c.bf16 %v81_v30, %v80_v29  ;;  %v51_v36 = vld [vmem:[#allocation2 + $0xb8] sm:$0xff] }
  0x1c   :  { %v34_v37 = vld [vmem:[#allocation2 + $0x30] sm:$0xff]  ;;  %1422 = vmatprep.subr.bf16.mxu0 %v1421_v26  ;;  %v1455_v38 = vpack.c.bf16 %v65_v32, %v64_v31  ;;  %v1425_v39 = vpack.c.bf16 %v51_v36, %v50_v35  ;;  %v35_v40 = vld [vmem:[#allocation2 + $0x38] sm:$0xff]  ;;  %v52_v49 = vld [vmem:[#allocation2 + $0xc0] sm:$0xff] }
  0x1d   :  { %1452 = vmatpush3.bf16.msra.mxu1 %v1451_v25  ;;  %v82_v41 = vld [vmem:[#allocation2 + $0x1b0] sm:$0xff]  ;;  %v83_v42 = vld [vmem:[#allocation2 + $0x1b8] sm:$0xff]  ;;  %v53_v50 = vld [vmem:[#allocation2 + $0xc8] sm:$0xff]  ;;  %v1427_v51 = vpack.c.bf16 %v35_v40, %v34_v37 }
  0x1e   :  { %1454 = vmatprep.subr.bf16.mxu1 %v1453_v34  ;;  %v1457_v46 = vpack.c.bf16 %v83_v42, %v82_v41  ;;  %v66_v47 = vld [vmem:[#allocation2 + $0x130] sm:$0xff]  ;;  %v67_v48 = vld [vmem:[#allocation2 + $0x138] sm:$0xff]  ;;  %v84_v52 = vld [vmem:[#allocation2 + $0x1c0] sm:$0xff]  ;;  %v1429_v55 = vpack.c.bf16 %v53_v50, %v52_v49 }
  0x1f   :  { %1424 = vmatpush3.bf16.msra.mxu0 %v1423_v33  ;;  %v85_v53 = vld [vmem:[#allocation2 + $0x1c8] sm:$0xff]  ;;  %v1459_v54 = vpack.c.bf16 %v67_v48, %v66_v47  ;;  %v36_v56 = vld [vmem:[#allocation2 + $0x40] sm:$0xff]  ;;  %v54_v63 = vld [vmem:[#allocation2 + $0xd0] sm:$0xff] }
  0x20   :  { %1426 = vmatprep.subr.bf16.mxu0 %v1425_v39  ;;  %v37_v57 = vld [vmem:[#allocation2 + $0x48] sm:$0xff]  ;;  %v68_v58 = vld [vmem:[#allocation2 + $0x140] sm:$0xff]  ;;  %v1461_v61 = vpack.c.bf16 %v85_v53, %v84_v52  ;;  %v55_v0 = vld [vmem:[#allocation2 + $0xd8] sm:$0xff] }
  0x21   :  { %1456 = vmatpush3.bf16.msra.mxu1 %v1455_v38  ;;  %v69_v62 = vld [vmem:[#allocation2 + $0x148] sm:$0xff]  ;;  %v86_v1 = vld [vmem:[#allocation2 + $0x1d0] sm:$0xff]  ;;  %v87_v2 = vld [vmem:[#allocation2 + $0x1d8] sm:$0xff]  ;;  %v1431_v3 = vpack.c.bf16 %v37_v57, %v36_v56  ;;  %v1433_v6 = vpack.c.bf16 %v55_v0, %v54_v63 }
  0x22   :  { %1458 = vmatprep.subr.bf16.mxu1 %v1457_v46  ;;  %v38_v4 = vld [vmem:[#allocation2 + $0x50] sm:$0xff]  ;;  %v1463_v5 = vpack.c.bf16 %v69_v62, %v68_v58  ;;  %v39_v7 = vld [vmem:[#allocation2 + $0x58] sm:$0xff]  ;;  %v1465_v11 = vpack.c.bf16 %v87_v2, %v86_v1  ;;  %v56_v12 = vld [vmem:[#allocation2 + $0xe0] sm:$0xff]  ;;  %v1726_v62 = vmov 0.0|0.0  }
  0x23   :  { %1428 = vmatpush3.bf16.msra.mxu0 %v1427_v51  ;;  %v70_v8 = vld [vmem:[#allocation2 + $0x150] sm:$0xff]  ;;  %v71_v9 = vld [vmem:[#allocation2 + $0x158] sm:$0xff]  ;;  %v57_v13 = vld [vmem:[#allocation2 + $0xe8] sm:$0xff]  ;;  %v1435_v16 = vpack.c.bf16 %v39_v7, %v38_v4 }
  0x24   :  { %1430 = vmatprep.subr.bf16.mxu0 %v1429_v55  ;;  %v88_v14 = vld [vmem:[#allocation2 + $0x1e0] sm:$0xff]  ;;  %v89_v15 = vld [vmem:[#allocation2 + $0x1e8] sm:$0xff]  ;;  %v1467_v17 = vpack.c.bf16 %v71_v9, %v70_v8  ;;  %v1437_v19 = vpack.c.bf16 %v57_v13, %v56_v12  ;;  %v58_v27 = vld [vmem:[#allocation2 + $0xf0] sm:$0xff] }
  0x25   :  { %1460 = vmatpush3.bf16.msra.mxu1 %v1459_v54  ;;  %v26_v18 = vld [vmem:[%s1885_s0] sm:$0xff]  ;;  %v41_v21 = vld [vmem:[#allocation2 + $0x68] sm:$0xff]  ;;  %v1469_v25 = vpack.c.bf16 %v89_v15, %v88_v14  ;;  %v59_v28 = vld [vmem:[#allocation2 + $0xf8] sm:$0xff] }
  0x26   :  { %1462 = vmatprep.subr.bf16.mxu1 %v1461_v61  ;;  %v40_v20 = vld [vmem:[#allocation2 + $0x60] sm:$0xff]  ;;  %v156_v23 = vrot.slane %v26_v18, %v1757_v10  ;;  %v149_v24 = vcombine.high %v26_v18, %v26_v18  ;;  %v73_v26 = vld [vmem:[#allocation2 + $0x168] sm:$0xff]  ;;  %v90_v29 = vld [vmem:[#allocation2 + $0x1f0] sm:$0xff]  ;;  %v1441_v35 = vpack.c.bf16 %v59_v28, %v58_v27 }
  0x27   :  { %1432 = vmatpush3.bf16.msra.mxu0 %v1431_v3  ;;  %v72_v22 = vld [vmem:[#allocation2 + $0x160] sm:$0xff]  ;;  %v91_v30 = vld [vmem:[#allocation2 + $0x1f8] sm:$0xff]  ;;  %v1439_v33 = vpack.c.bf16 %v41_v21, %v40_v20  ;;  %v42_v36 = vld [vmem:[#allocation2 + $0x70] sm:$0xff] }
  0x28   :  { %1434 = vmatprep.subr.bf16.mxu0 %v1433_v6  ;;  %v164_v31 = vcombine.high %v156_v23, %v156_v23  ;;  %v163_v32 = vrot.slane %v149_v24, %v1757_v10  ;;  %v1471_v34 = vpack.c.bf16 %v73_v26, %v72_v22  ;;  %v43_v37 = vld [vmem:[#allocation2 + $0x78] sm:$0xff]  ;;  %v74_v38 = vld [vmem:[#allocation2 + $0x170] sm:$0xff]  ;;  %v1473_v40 = vpack.c.bf16 %v91_v30, %v90_v29  ;;  %v108_v42 = vld [vmem:[#allocation2 + $0x280] sm:$0xff] }
  0x29   :  { %1464 = vmatpush3.bf16.msra.mxu1 %v1463_v5  ;;  %v75_v41 = vld [vmem:[#allocation2 + $0x178] sm:$0xff]  ;;  %v109_v43 = vld [vmem:[#allocation2 + $0x288] sm:$0xff]  ;;  %v1443_v44 = vpack.c.bf16 %v43_v37, %v42_v36  ;;  %v92_v45 = vld [vmem:[#allocation2 + $0x200] sm:$0xff] }
  0x2a   :  { %1466 = vmatprep.subr.bf16.mxu1 %v1465_v11  ;;  %v165_v39 = vcombine.high %v163_v32, %v163_v32  ;;  %255 = vmatprep.mubr.f32.mxu0 %v164_v31  ;;  %v1475_v46 = vpack.c.bf16 %v75_v41, %v74_v38  ;;  %v1477_v47 = vpack.c.bf16 %v109_v43, %v108_v42  ;;  %v93_v48 = vld [vmem:[#allocation2 + $0x208] sm:$0xff]  ;;  %v124_v49 = vld [vmem:[#allocation2 + $0x300] sm:$0xff]  ;;  %v110_v52 = vld [vmem:[#allocation2 + $0x290] sm:$0xff]  ;;  %v1728_v11 = vmov 0.0  }
  0x2b   :  { %1436 = vmatpush3.bf16.msra.mxu0 %v1435_v16  ;;  %v27_v50 = vld [vmem:[%s1885_s0 + $0x8] sm:$0x3f]  ;;  %v111_v53 = vld [vmem:[#allocation2 + $0x298] sm:$0xff]  ;;  %v1479_v55 = vpack.c.bf16 %v93_v48, %v92_v45  ;;  %v94_v59 = vld [vmem:[#allocation2 + $0x210] sm:$0xff]  ;;  %s1729_s0 = smov [#allocation5]  }
  0x2c   :  { %1438 = vmatprep.subr.bf16.mxu0 %v1437_v19  ;;  %325 = vmatprep.mubr.f32.mxu1 %v165_v39  ;;  %v125_v51 = vld [vmem:[#allocation2 + $0x308] sm:$0xff]  ;;  %v1768_v54 = vrot.slane %v27_v50, %v1757_v10  ;;  %v166_v56 = vcombine.high %v27_v50, %v27_v50  ;;  %v1481_v58 = vpack.c.bf16 %v111_v53, %v110_v52  ;;  %v95_v60 = vld [vmem:[#allocation2 + $0x218] sm:$0xff]  ;;  %v126_v61 = vld [vmem:[#allocation2 + $0x310] sm:$0xff]  ;;  %s973_s26 = sshll.u32 %s1729_s0, 4  ;;  %s974_s26 = int_to_ptr.vmem [resolvable:$true] %s973_s26 }
  0x2d   :  { %1468 = vmatpush3.bf16.msra.mxu1 %v1467_v17  ;;  %v1510_v57 = vpack.c.bf16 %v125_v51, %v124_v49  ;;  %v127_v63 = vld [vmem:[#allocation2 + $0x318] sm:$0xff]  ;;  %v112_v0 = vld [vmem:[#allocation2 + $0x2a0] sm:$0xff]  ;;  %v113_v1 = vld [vmem:[#allocation2 + $0x2a8] sm:$0xff]  ;;  %v1483_v3 = vpack.c.bf16 %v95_v60, %v94_v59  ;;  %s1696_s27 = scalar_lea.vmem %s974_s26, 32  ;;  %p1701_p9 = scmp.lt.s32.totalorder %s974_s26, %s974_s26 }
  0x2e   :  { %1470 = vmatprep.subr.bf16.mxu1 %v1469_v25  ;;  %v181_v2 = vcombine.high %v1768_v54, %v1768_v54  ;;  %v180_v4 = vrot.slane %v166_v56, %v1757_v10  ;;  %v1774_v5 = vpack.c.bf16 %v127_v63, %v126_v61  ;;  %v1485_v6 = vpack.c.bf16 %v113_v1, %v112_v0  ;;  %v96_v7 = vld [vmem:[#allocation2 + $0x220] sm:$0xff]  ;;  %v97_v8 = vld [vmem:[#allocation2 + $0x228] sm:$0xff]  ;;  %v114_v13 = vld [vmem:[#allocation2 + $0x2b0] sm:$0xff]  ;;  %p1697_p8 = scmp.ne.s32.totalorder %s974_s26, %s1696_s27  ;;  %p1702_p10 = scmp.lt.s32.totalorder %s1696_s27, %s1696_s27 }
  0x2f   :  { %1440 = vmatpush3.bf16.msra.mxu0 %v1439_v33  ;;  %v128_v9 = vld [vmem:[#allocation2 + $0x320] sm:$0xff]  ;;  %v129_v12 = vld [vmem:[#allocation2 + $0x328] sm:$0xff]  ;;  %v115_v14 = vld [vmem:[#allocation2 + $0x2b8] sm:$0xff]  ;;  %v1487_v10 = vpack.c.bf16 %v97_v8, %v96_v7 }
  0x30   :  { %1442 = vmatprep.subr.bf16.mxu0 %v1441_v35  ;;  %v1780_v15 = vpack.c.bf16 %v129_v12, %v128_v9  ;;  %v1489_v16 = vpack.c.bf16 %v115_v14, %v114_v13  ;;  %v98_v17 = vld [vmem:[#allocation2 + $0x230] sm:$0xff]  ;;  %v99_v18 = vld [vmem:[#allocation2 + $0x238] sm:$0xff]  ;;  %v116_v21 = vld [vmem:[#allocation2 + $0x2c0] sm:$0xff]  ;;  %p1703_p11 = por %p1702_p10, %p1701_p9 }
  0x31   :  { %1472 = vmatpush3.bf16.msra.mxu1 %v1471_v34  ;;  %v130_v19 = vld [vmem:[#allocation2 + $0x330] sm:$0xff]  ;;  %v131_v20 = vld [vmem:[#allocation2 + $0x338] sm:$0xff]  ;;  %v117_v22 = vld [vmem:[#allocation2 + $0x2c8] sm:$0xff] }
  0x32   :  { %1474 = vmatprep.subr.bf16.mxu1 %v1473_v40  ;;  %v1786_v24 = vpack.c.bf16 %v131_v20, %v130_v19  ;;  %v1493_v25 = vpack.c.bf16 %v117_v22, %v116_v21  ;;  %v100_v26 = vld [vmem:[#allocation2 + $0x240] sm:$0xff]  ;;  %v101_v27 = vld [vmem:[#allocation2 + $0x248] sm:$0xff]  ;;  %v118_v30 = vld [vmem:[#allocation2 + $0x2d0] sm:$0xff]  ;;  %p1704_p12 = pnand %p1703_p11, %p1697_p8 }
  0x33   :  { %1444 = vmatpush3.bf16.msra.mxu0 %v1443_v44  ;;  %v132_v28 = vld [vmem:[#allocation2 + $0x340] sm:$0xff]  ;;  %v133_v29 = vld [vmem:[#allocation2 + $0x348] sm:$0xff]  ;;  %v119_v31 = vld [vmem:[#allocation2 + $0x2d8] sm:$0xff] }
  0x34   :  { %1478 = vmatprep.subr.bf16.mxu0 %v1477_v47  ;;  %v1522_v33 = vpack.c.bf16 %v133_v29, %v132_v28  ;;  %v1497_v34 = vpack.c.bf16 %v119_v31, %v118_v30  ;;  %v102_v35 = vld [vmem:[#allocation2 + $0x250] sm:$0xff]  ;;  %v103_v36 = vld [vmem:[#allocation2 + $0x258] sm:$0xff]  ;;  %v120_v39 = vld [vmem:[#allocation2 + $0x2e0] sm:$0xff] }
  0x35   :  { %1476 = vmatpush3.bf16.msra.mxu1 %v1475_v46  ;;  %v134_v37 = vld [vmem:[#allocation2 + $0x350] sm:$0xff]  ;;  %v135_v38 = vld [vmem:[#allocation2 + $0x358] sm:$0xff]  ;;  %v121_v40 = vld [vmem:[#allocation2 + $0x2e8] sm:$0xff]  ;;  %v1499_v41 = vpack.c.bf16 %v103_v36, %v102_v35 }
  0x36   :  { %1509 = vmatprep.subr.bf16.mxu1 %v1726_v62  ;;  %256 = vmatmul.mubr.f32.vlgmr.msra.gmra.mrb[0].mxu0 %v156_v23  ;;  %v1491_v23 = vpack.c.bf16 %v99_v18, %v98_v17  ;;  %v1525_v42 = vpack.c.bf16 %v135_v38, %v134_v37  ;;  %v1501_v43 = vpack.c.bf16 %v121_v40, %v120_v39  ;;  %v104_v44 = vld [vmem:[#allocation2 + $0x260] sm:$0xff]  ;;  %v105_v45 = vld [vmem:[#allocation2 + $0x268] sm:$0xff]  ;;  %v122_v48 = vld [vmem:[#allocation2 + $0x2f0] sm:$0xff] }
  0x37   :  { %1480 = vmatpush3.bf16.msra.mxu0 %v1479_v55  ;;  %395 = vmatprep.mubr.f32.mxu0 %v181_v2  ;;  %v136_v46 = vld [vmem:[#allocation2 + $0x360] sm:$0xff]  ;;  %v137_v47 = vld [vmem:[#allocation2 + $0x368] sm:$0xff]  ;;  %v123_v49 = vld [vmem:[#allocation2 + $0x2f8] sm:$0xff]  ;;  %v1503_v50 = vpack.c.bf16 %v105_v45, %v104_v44 }
  0x38   :  { %326 = vmatmul.mubr.f32.vlgmr.msra.gmra.mrb[0].mxu1 %v163_v32  ;;  %1482 = vmatprep.subr.bf16.mxu0 %v1481_v58  ;;  %v1495_v32 = vpack.c.bf16 %v101_v27, %v100_v26  ;;  %v1528_v51 = vpack.c.bf16 %v137_v47, %v136_v46  ;;  %v1505_v52 = vpack.c.bf16 %v123_v49, %v122_v48  ;;  %v106_v53 = vld [vmem:[#allocation2 + $0x270] sm:$0xff]  ;;  %v107_v55 = vld [vmem:[#allocation2 + $0x278] sm:$0xff]  ;;  %v140_v60 = vld [vmem:[#allocation2 + $0x380] sm:$0xff] }
  0x39   :  { %1511 = vmatpush3.bf16.msra.mxu1 %v1510_v57  ;;  %1200 = vmatprep.mubr.msk.f32.mxu1 %vm1727_vm1, %v1728_v11  ;;  %v138_v56 = vld [vmem:[#allocation2 + $0x370] sm:$0xff]  ;;  %v139_v57 = vld [vmem:[#allocation2 + $0x378] sm:$0xff]  ;;  %v1507_v58 = vpack.c.bf16 %v107_v55, %v106_v53  ;;  %v141_v61 = vld [vmem:[#allocation2 + $0x388] sm:$0xff] }
  0x3a   :  { %1512 = vmatprep.subr.bf16.mxu1 %v1726_v62  ;;  %v1531_v59 = vpack.c.bf16 %v139_v57, %v138_v56  ;;  %v1534_v63 = vpack.c.bf16 %v141_v61, %v140_v60  ;;  %v621_v0 = vld [vmem:[#allocation2 + $0x3a0] sm:$0xff]  ;;  %v622_v2 = vld [vmem:[#allocation2 + $0x3a8] sm:$0xff]  ;;  %v627_v9 = vld [vmem:[#allocation2 + $0x3d0] sm:$0xff] }
  0x3b   :  { %1484 = vmatpush3.bf16.msra.mxu0 %v1483_v3  ;;  %v623_v3 = vld [vmem:[#allocation2 + $0x3b0] sm:$0xff]  ;;  %v626_v8 = vld [vmem:[#allocation2 + $0x3c8] sm:$0xff]  ;;  %v636_v31 = vld [vmem:[#allocation2 + $0x418] sm:$0xff] }
  0x3c   :  { %1201 = vmatmul.mubr.msk.f32.vlgmr.msra.gmra.mrb[2].mxu1 %vm188_vm0, %v180_v4  ;;  %1486 = vmatprep.subr.bf16.mxu0 %v1485_v6  ;;  %v1564_v4 = vpack.c.bf16 %v623_v3, %v622_v2  ;;  %v625_v6 = vld [vmem:[#allocation2 + $0x3c0] sm:$0xff]  ;;  %v1570_v12 = vpack.c.bf16 %v627_v9, %v626_v8  ;;  %v982_v14 = vld [vmem:[#allocation2 + $0x390] ss:$0 sm:$0xff]  ;;  %v640_v38 = vld [vmem:[#allocation2 + $0x438] sm:$0xff] }
  0x3d   :  { %1514 = vmatpush3.bf16.msra.mxu1 %v1774_v5  ;;  %1235 = vmatprep.mubr.msk.f32.mxu1 %vm1727_vm1, %v1728_v11  ;;  %v639_v35 = vld [vmem:[#allocation2 + $0x430] sm:$0xff]  ;;  %v641_v39 = vld [vmem:[#allocation2 + $0x440] sm:$0xff]  ;;  %v628_v44 = vld [vmem:[#allocation2 + $0x3d8] sm:$0xff] }
  0x3e   :  { %1515 = vmatprep.subr.bf16.mxu1 %v1726_v62  ;;  %v1833_v40 = vpack.c.bf16 %v641_v39, %v640_v38  ;;  %v629_v45 = vld [vmem:[#allocation2 + $0x3e0] sm:$0xff]  ;;  %v644_v47 = vld [vmem:[#allocation2 + $0x458] sm:$0xff]  ;;  %v646_v53 = vld [vmem:[#allocation2 + $0x468] sm:$0xff] }
  0x3f   :  { %1488 = vmatpush3.bf16.msra.mxu0 %v1487_v10  ;;  %v1573_v46 = vpack.c.bf16 %v629_v45, %v628_v44  ;;  %v645_v48 = vld [vmem:[#allocation2 + $0x460] sm:$0xff]  ;;  %v647_v55 = vld [vmem:[#allocation2 + $0x470] sm:$0xff]  ;;  %v632_v57 = vld [vmem:[#allocation2 + $0x3f8] sm:$0xff] }
  0x40   :  { %1490 = vmatprep.subr.bf16.mxu0 %v1489_v16  ;;  %v1597_v49 = vpack.c.bf16 %v645_v48, %v644_v47  ;;  %v1600_v56 = vpack.c.bf16 %v647_v55, %v646_v53  ;;  %v649_v61 = vld [vmem:[#allocation2 + $0x480] sm:$0xff]  ;;  %v651_v2 = vld [vmem:[#allocation2 + $0x490] sm:$0xff]  ;;  %v888_v38 = vld [vmem:[#allocation2 + $0x508] sm:$0xff] }
  0x41   :  { %1517 = vmatpush3.bf16.msra.mxu1 %v1780_v15 }
  0x42   :  { %1518 = vmatprep.subr.bf16.mxu1 %v1726_v62 }
  0x43   :  { %1492 = vmatpush3.bf16.msra.mxu0 %v1491_v23 }
  0x44   :  { %1494 = vmatprep.subr.bf16.mxu0 %v1493_v25 }
  0x45   :  { %1520 = vmatpush3.bf16.msra.mxu1 %v1786_v24 }
  0x46   :  { %1521 = vmatprep.subr.bf16.mxu1 %v1726_v62 }
  0x47   :  { %1496 = vmatpush3.bf16.msra.mxu0 %v1495_v32  ;;  %v637_v32 = vld [vmem:[#allocation2 + $0x420] sm:$0xff] }
  0x48   :  { %1498 = vmatprep.subr.bf16.mxu0 %v1497_v34  ;;  %v638_v34 = vld [vmem:[#allocation2 + $0x428] sm:$0xff] }
  0x49   :  { %1523 = vmatpush3.bf16.msra.mxu1 %v1522_v33  ;;  %v1827_v37 = vpack.c.bf16 %v639_v35, %v638_v34  ;;  %v885_v34 = vld [vmem:[#allocation2 + $0x4f0] sm:$0xff]  ;;  %v886_v35 = vld [vmem:[#allocation2 + $0x4f8] sm:$0xff] }
  0x4a   :  { %1524 = vmatprep.subr.bf16.mxu1 %v1726_v62 }
  0x4b   :  { %1500 = vmatpush3.bf16.msra.mxu0 %v1499_v41  ;;  %v642_v41 = vld [vmem:[#allocation2 + $0x448] sm:$0xff] }
  0x4c   :  { %1502 = vmatprep.subr.bf16.mxu0 %v1501_v43 }
  0x4d   :  { %1526 = vmatpush3.bf16.msra.mxu1 %v1525_v42 }
  0x4e   :  { %1527 = vmatprep.subr.bf16.mxu1 %v1726_v62 }
  0x4f   :  { %1504 = vmatpush3.bf16.msra.mxu0 %v1503_v50  ;;  %v630_v50 = vld [vmem:[#allocation2 + $0x3e8] sm:$0xff] }
  0x50   :  { %1506 = vmatprep.subr.bf16.mxu0 %v1505_v52 }
  0x51   :  { %1529 = vmatpush3.bf16.msra.mxu1 %v1528_v51 }
  0x52   :  { %1530 = vmatprep.subr.bf16.mxu1 %v1726_v62 }
  0x53   :  { %1508 = vmatpush3.bf16.msra.mxu0 %v1507_v58  ;;  %v633_v58 = vld [vmem:[#allocation2 + $0x400] sm:$0xff] }
  0x54   :  { %1536 = vmatprep.subr.bf16.mxu0 %v1726_v62  ;;  %v1579_v60 = vpack.c.bf16 %v633_v58, %v632_v57 }
  0x55   :  { %1532 = vmatpush3.bf16.msra.mxu1 %v1531_v59 }
  0x56   :  { %1533 = vmatprep.subr.bf16.mxu1 %v1726_v62  ;;  %396 = vmatmul.mubr.f32.vlgmr.msra.gmra.mrb[2].mxu0 %v1768_v54  ;;  %v620_v54 = vld [vmem:[#allocation2 + $0x398] sm:$0xff] }
  0x57   :  { %1538 = vmatpush3.bf16.msra.mxu0 %v1774_v5  ;;  %1270 = vmatprep.mubr.msk.f32.mxu0 %vm1727_vm1, %v1728_v11  ;;  %v1561_v1 = vpack.c.bf16 %v621_v0, %v620_v54  ;;  %v624_v5 = vld [vmem:[#allocation2 + $0x3b8] sm:$0xff]  ;;  %v634_v54 = vld [vmem:[#allocation2 + $0x408] sm:$0xff]  ;;  %v635_v0 = vld [vmem:[#allocation2 + $0x410] sm:$0xff] }
  0x58   :  { %1539 = vmatprep.subr.bf16.mxu0 %v1726_v62  ;;  %v1567_v7 = vpack.c.bf16 %v625_v6, %v624_v5  ;;  %v1582_v3 = vpack.c.bf16 %v635_v0, %v634_v54 }
  0x59   :  { %1535 = vmatpush3.bf16.msra.mxu1 %v1534_v63 }
  0x5a   :  { %1560 = vmatprep.subr.bf16.mxu1 %v1726_v62 }
  0x5b   :  { %1541 = vmatpush3.bf16.msra.mxu0 %v1780_v15 }
  0x5c   :  { %1236 = vmatmul.mubr.f32.vlgmr.msra.gmra.mrb[4].mxu1 %v1728_v11  ;;  %1542 = vmatprep.subr.bf16.mxu0 %v1726_v62 }
  0x5d   :  { %1305 = vmatprep.mubr.msk.f32.mxu1 %vm1727_vm1, %v1728_v11  ;;  %1562 = vmatpush3.bf16.msra.mxu1 %v1561_v1  ;;  %v650_v1 = vld [vmem:[#allocation2 + $0x488] sm:$0xff] }
  0x5e   :  { %1563 = vmatprep.subr.bf16.mxu1 %v1726_v62 }
  0x5f   :  { %1544 = vmatpush3.bf16.msra.mxu0 %v1786_v24 }
  0x60   :  { %1545 = vmatprep.subr.bf16.mxu0 %v1726_v62 }
  0x61   :  { %1565 = vmatpush3.bf16.msra.mxu1 %v1564_v4  ;;  %v1606_v4 = vpack.c.bf16 %v651_v2, %v650_v1 }
  0x62   :  { %1566 = vmatprep.subr.bf16.mxu1 %v1726_v62 }
  0x63   :  { %1547 = vmatpush3.bf16.msra.mxu0 %v1522_v33  ;;  %v1821_v33 = vpack.c.bf16 %v637_v32, %v636_v31  ;;  %v883_v31 = vld [vmem:[#allocation2 + $0x4e0] sm:$0xff]  ;;  %v884_v32 = vld [vmem:[#allocation2 + $0x4e8] sm:$0xff] }
  0x64   :  { %1548 = vmatprep.subr.bf16.mxu0 %v1726_v62 }
  0x65   :  { %1568 = vmatpush3.bf16.msra.mxu1 %v1567_v7 }
  0x66   :  { %1569 = vmatprep.subr.bf16.mxu1 %v1726_v62 }
  0x67   :  { %1550 = vmatpush3.bf16.msra.mxu0 %v1525_v42  ;;  %v643_v42 = vld [vmem:[#allocation2 + $0x450] sm:$0xff] }
  0x68   :  { %1551 = vmatprep.subr.bf16.mxu0 %v1726_v62  ;;  %v1594_v43 = vpack.c.bf16 %v643_v42, %v642_v41  ;;  %v890_v41 = vld [vmem:[#allocation2 + $0x518] sm:$0xff] }
  0x69   :  { %1571 = vmatpush3.bf16.msra.mxu1 %v1570_v12 }
  0x6a   :  { %1572 = vmatprep.subr.bf16.mxu1 %v1726_v62 }
  0x6b   :  { %1553 = vmatpush3.bf16.msra.mxu0 %v1528_v51  ;;  %v631_v51 = vld [vmem:[#allocation2 + $0x3f0] sm:$0xff] }
  0x6c   :  { %1554 = vmatprep.subr.bf16.mxu0 %v1726_v62  ;;  %v1576_v52 = vpack.c.bf16 %v631_v51, %v630_v50 }
  0x6d   :  { %1574 = vmatpush3.bf16.msra.mxu1 %v1573_v46 }
  0x6e   :  { %1575 = vmatprep.subr.bf16.mxu1 %v1726_v62 }
  0x6f   :  { %1556 = vmatpush3.bf16.msra.mxu0 %v1531_v59  ;;  %v648_v59 = vld [vmem:[#allocation2 + $0x478] sm:$0xff] }
  0x70   :  { %1557 = vmatprep.subr.bf16.mxu0 %v1726_v62 }
  0x71   :  { %1577 = vmatpush3.bf16.msra.mxu1 %v1576_v52 }
  0x72   :  { %1578 = vmatprep.subr.bf16.mxu1 %v1726_v62 }
  0x73   :  { %1559 = vmatpush3.bf16.msra.mxu0 %v1534_v63  ;;  %v1603_v63 = vpack.c.bf16 %v649_v61, %v648_v59 }
  0x74   :  { %1584 = vmatprep.subr.bf16.mxu0 %v1726_v62 }
  0x75   :  { %1580 = vmatpush3.bf16.msra.mxu1 %v1579_v60 }
  0x76   :  { %1581 = vmatprep.subr.bf16.mxu1 %v1726_v62 }
  0x79   :  { %1583 = vmatpush3.bf16.msra.mxu1 %v1582_v3 }
  0x7a   :  { %1608 = vmatprep.subr.bf16.mxu1 %v1726_v62 }
 0x109   :  { %v1018_v13 = vpop.f32.mrb[0].mxu0 }
 0x10a   :  { %v1019_v10 = vpop.f32.mrb[1].mxu0 }
 0x10b   :  { %v1053_v15 = vpop.f32.mrb[0].mxu1  ;;  %v1020_v16 = vadd.f32 %v1019_v10, %v1018_v13  ;;  %v876_v10 = vld [vmem:[#allocation2 + $0x4a8] sm:$0xff] }
 0x10c   :  { %v1054_v17 = vpop.f32.mrb[1].mxu1 }
 0x10d   :  { %v1055_v18 = vadd.f32 %v1054_v17, %v1053_v15  ;;  %v258_v19 = vadd.f32 %v1020_v16, %v982_v14  ;;  %v875_v14 = vld [vmem:[#allocation2 + $0x4a0] sm:$0xff]  ;;  %v877_v15 = vld [vmem:[#allocation2 + $0x4b0] sm:$0xff]  ;;  %v878_v17 = vld [vmem:[#allocation2 + $0x4b8] sm:$0xff] }
 0x10e   :  { %v1633_v16 = vpack.c.bf16 %v876_v10, %v875_v14 }
 0x10f   :  { %v467_v20 = vpop.f32.mrb[2].mxu1  ;;  %v328_v21 = vadd.f32 %v1055_v18, %v258_v19  ;;  %v1636_v18 = vpack.c.bf16 %v878_v17, %v877_v15  ;;  %v879_v19 = vld [vmem:[#allocation2 + $0x4c0] sm:$0xff] }
 0x110   :  { %v1202_v22 = vpop.f32.mrb[3].mxu1 }
 0x111   :  { %v881_v22 = vld [vmem:[#allocation2 + $0x4d0] sm:$0xff] }
 0x129   :  { %v1088_v23 = vpop.f32.mrb[2].mxu0 }
 0x12a   :  { %v1089_v24 = vpop.f32.mrb[3].mxu0 }
 0x12b   :  { %v1090_v25 = vadd.f32 %v1089_v24, %v1088_v23  ;;  %v882_v23 = vld [vmem:[#allocation2 + $0x4d8] sm:$0xff] }
 0x12c   :  { %v1642_v24 = vpack.c.bf16 %v882_v23, %v881_v22 }
 0x12d   :  { %v398_v26 = vadd.f32 %v1090_v25, %v328_v21  ;;  %v984_v25 = vld [vmem:[#allocation2 + $0x498] ss:$0 sm:$0xff] }
 0x12f   :  { %v537_v27 = vpop.f32.mrb[4].mxu1  ;;  %v1818_v28 = vadd.f32 %v467_v20, %v398_v26  ;;  %v880_v20 = vld [vmem:[#allocation2 + $0x4c8] sm:$0xff] }
 0x130   :  { %v1237_v29 = vpop.f32.mrb[5].mxu1  ;;  %v1639_v21 = vpack.c.bf16 %v880_v20, %v879_v19 }
 0x131   :  { %v541_v30 = vadd.f32 %v537_v27, %v1818_v28 }
 0x133   :  { %1666 = vtanh.f32 %v541_v30 }
 0x13d   :  { %v1823_v36 = vpop.eup %1666 }
 0x13e   :  { %1271 = vmatmul.mubr.f32.vlgmr.msra.gmra.mrb[4].mxu0 %v1823_v36 }
 0x13f   :  { %1586 = vmatpush3.bf16.msra.mxu0 %v1821_v33  ;;  %1340 = vmatprep.mubr.msk.f32.mxu0 %vm1727_vm1, %v1728_v11 }
 0x140   :  { %1587 = vmatprep.subr.bf16.mxu0 %v1726_v62 }
 0x143   :  { %1589 = vmatpush3.bf16.msra.mxu0 %v1827_v37 }
 0x144   :  { %1590 = vmatprep.subr.bf16.mxu0 %v1726_v62 }
 0x147   :  { %1592 = vmatpush3.bf16.msra.mxu0 %v1833_v40 }
 0x148   :  { %1593 = vmatprep.subr.bf16.mxu0 %v1726_v62 }
 0x14b   :  { %1595 = vmatpush3.bf16.msra.mxu0 %v1594_v43 }
 0x14c   :  { %1596 = vmatprep.subr.bf16.mxu0 %v1726_v62 }
 0x14f   :  { %1598 = vmatpush3.bf16.msra.mxu0 %v1597_v49 }
 0x150   :  { %1599 = vmatprep.subr.bf16.mxu0 %v1726_v62 }
 0x153   :  { %1601 = vmatpush3.bf16.msra.mxu0 %v1600_v56 }
 0x154   :  { %1602 = vmatprep.subr.bf16.mxu0 %v1726_v62 }
 0x157   :  { %1604 = vmatpush3.bf16.msra.mxu0 %v1603_v63 }
 0x158   :  { %1605 = vmatprep.subr.bf16.mxu0 %v1726_v62 }
 0x15b   :  { %1607 = vmatpush3.bf16.msra.mxu0 %v1606_v4 }
 0x15c   :  { %1632 = vmatprep.subr.bf16.mxu0 %v1726_v62 }
 0x15e   :  { %1341 = vmatmul.mubr.f32.vlgmr.msra.gmra.mrb[6].mxu0 %v1728_v11 }
 0x15f   :  { %1410 = vmatprep.mubr.msk.f32.mxu0 %vm1727_vm1, %v1728_v11  ;;  %1634 = vmatpush3.bf16.msra.mxu0 %v1633_v16 }
 0x160   :  { %1635 = vmatprep.subr.bf16.mxu0 %v1726_v62 }
 0x163   :  { %1637 = vmatpush3.bf16.msra.mxu0 %v1636_v18 }
 0x164   :  { %1638 = vmatprep.subr.bf16.mxu0 %v1726_v62 }
 0x167   :  { %1640 = vmatpush3.bf16.msra.mxu0 %v1639_v21 }
 0x168   :  { %1641 = vmatprep.subr.bf16.mxu0 %v1726_v62 }
 0x16b   :  { %1643 = vmatpush3.bf16.msra.mxu0 %v1642_v24 }
 0x16c   :  { %1644 = vmatprep.subr.bf16.mxu0 %v1726_v62 }
 0x211   :  { %v609_v5 = vpop.f32.mrb[4].mxu0 }
 0x212   :  { %v614_v6 = vrot.slane %v609_v5, 7  ;;  %v1272_v7 = vpop.f32.mrb[5].mxu0 }
 0x214   :  { %v616_v8 = vadd.f32 %v614_v6, %v1818_v28 }
 0x216   :  { %1668 = vtanh.f32 %v616_v8 }
 0x220   :  { %v1669_v9 = vpop.eup %1668 }
 0x221   :  { %v619_v12 = vsel %vm618_vm2, %v1823_v36, %v1669_v9  ;;  %v1648_v36 = vpack.c.bf16 %v886_v35, %v885_v34 }
 0x222   :  { %1306 = vmatmul.mubr.f32.vlgmr.msra.gmra.mrb[6].mxu1 %v619_v12 }
 0x223   :  { %1610 = vmatpush3.bf16.msra.mxu1 %v1821_v33  ;;  %1375 = vmatprep.mubr.msk.f32.mxu1 %vm1727_vm1, %v1728_v11  ;;  %v1645_v33 = vpack.c.bf16 %v884_v32, %v883_v31 }
 0x224   :  { %1611 = vmatprep.subr.bf16.mxu1 %v1726_v62 }
 0x225   :  { %1646 = vmatpush3.bf16.msra.mxu0 %v1645_v33 }
 0x226   :  { %1647 = vmatprep.subr.bf16.mxu0 %v1726_v62 }
 0x227   :  { %1613 = vmatpush3.bf16.msra.mxu1 %v1827_v37  ;;  %v887_v37 = vld [vmem:[#allocation2 + $0x500] sm:$0xff] }
 0x228   :  { %1614 = vmatprep.subr.bf16.mxu1 %v1726_v62  ;;  %v1651_v39 = vpack.c.bf16 %v888_v38, %v887_v37 }
 0x229   :  { %1649 = vmatpush3.bf16.msra.mxu0 %v1648_v36 }
 0x22a   :  { %1650 = vmatprep.subr.bf16.mxu0 %v1726_v62 }
 0x22b   :  { %1616 = vmatpush3.bf16.msra.mxu1 %v1833_v40  ;;  %v889_v40 = vld [vmem:[#allocation2 + $0x510] sm:$0xff] }
 0x22c   :  { %1617 = vmatprep.subr.bf16.mxu1 %v1726_v62  ;;  %v1654_v42 = vpack.c.bf16 %v890_v41, %v889_v40 }
 0x22d   :  { %1652 = vmatpush3.bf16.msra.mxu0 %v1651_v39 }
 0x22e   :  { %1653 = vmatprep.subr.bf16.mxu0 %v1726_v62 }
 0x22f   :  { %1619 = vmatpush3.bf16.msra.mxu1 %v1594_v43 }
 0x230   :  { %1620 = vmatprep.subr.bf16.mxu1 %v1726_v62 }
 0x231   :  { %v793_v11 = vpop.f32.mrb[6].mxu0  ;;  %1655 = vmatpush3.bf16.msra.mxu0 %v1654_v42 }
 0x232   :  { %v1342_v13 = vpop.f32.mrb[7].mxu0 }
 0x233   :  { %1622 = vmatpush3.bf16.msra.mxu1 %v1597_v49  ;;  %v985_v49 = vld [vmem:[#allocation2 + $0x520] ss:$0 sm:$0xff] }
 0x234   :  { %1623 = vmatprep.subr.bf16.mxu1 %v1726_v62 }
 0x237   :  { %1625 = vmatpush3.bf16.msra.mxu1 %v1600_v56 }
 0x238   :  { %1626 = vmatprep.subr.bf16.mxu1 %v1726_v62 }
 0x23b   :  { %1628 = vmatpush3.bf16.msra.mxu1 %v1603_v63 }
 0x23c   :  { %1629 = vmatprep.subr.bf16.mxu1 %v1726_v62 }
 0x23f   :  { %1631 = vmatpush3.bf16.msra.mxu1 %v1606_v4 }
 0x2f5   :  { %v723_v26 = vpop.f32.mrb[6].mxu1 }
 0x2f6   :  { %v724_v27 = vadd.f32 %v984_v25, %v723_v26  ;;  %v1307_v28 = vpop.f32.mrb[7].mxu1 }
 0x2f8   :  { %v797_v29 = vadd.f32 %v793_v11, %v724_v27 }
 0x2fa   :  { %1670 = vtanh.f32 %v797_v29 }
 0x304   :  { %v1671_v30 = vpop.eup %1670 }
 0x305   :  { %1376 = vmatmul.mubr.f32.vlgmr.msra.gmra.mrb[8].mxu1 %v1671_v30 }
 0x3d8   :  { %v865_v43 = vpop.f32.mrb[8].mxu1 }
 0x3d9   :  { %v870_v44 = vrot.slane %v865_v43, 7  ;;  %v1377_v45 = vpop.f32.mrb[9].mxu1 }
 0x3db   :  { %v872_v46 = vadd.f32 %v870_v44, %v724_v27 }
 0x3dd   :  { %1672 = vtanh.f32 %v872_v46 }
 0x3e7   :  { %v1673_v47 = vpop.eup %1672 }
 0x3e8   :  { %v874_v48 = vsel %vm618_vm2, %v1671_v30, %v1673_v47 }
 0x3e9   :  { %1411 = vmatmul.mubr.f32.vlgmr.msra.gmra.mrb[8].mxu0 %v874_v48 }
 0x4bc   :  { %v962_v50 = vpop.f32.mrb[8].mxu0 }
 0x4bd   :  { %v963_v51 = vadd.f32 %v985_v49, %v962_v50  ;;  %v1412_v52 = vpop.f32.mrb[9].mxu0 }
 0x4bf   :  { %966 = vst [vmem:[#allocation5] sm:$0x3] %v963_v51 }
 0x4c0   :  { %1707 = shalt.err (!%p1704_p12)
}
 0x4c1   :  { %s1708_s30 = scalar_lea.hbm %s1887_s2, 32 }
 0x4c2   :  { %p1709_p13 = scmp.ne.s32.totalorder %s1887_s2, %s1708_s30  ;;  %p1712_p0 = scmp.lt.u32.totalorder %s1708_s30, %s1887_s2 }
 0x4c4   :  { %p1714_p1 = pnand %p1712_p0, %p1709_p13 }
 0x4c6   :  { %1717 = shalt.err (!%p1714_p1)
}
 0x4c7   :  { %976 = dma.vmem_to_hbm [thread:$0]  %s974_s26, 32, %s1887_s2, [#allocation4]  }
 0x4c8   :  { %1720 = dma.done.wait [#allocation4], 32  }
 0x4c9   :  { %1721 = vsyncadd [#allocation4], 4294967264 }
 0x4ca   :  { %980 = vsyncpa [#allocation3], 1 }
 0x4cb   :  { %981 = vsyncpa [#allocation4], 1 }

</bundles_post_ra>
